<compile_context>
chip_gen: v6e
topology: v6e:2x2x1
jax: 0.10.0
libtpu: 0.0.40
codegen_flags: <defaults>
</compile_context>

<pallas_src>
import math

import jax
import jax.numpy as jnp
from jax.experimental import pallas as pl
from jax.experimental.pallas import tpu as pltpu

EPS = 1e-5  # nn.LayerNorm default


# ----------------------------------------------------------------------------
# Parameter preparation (call once, reuse across steps).
# ----------------------------------------------------------------------------
def prepare_params(gamma, beta, weight):
    """Fold LayerNorm gamma/beta into the linear weight / an output bias and
    split W^T into the even-h ([x0|x2]) / odd-h ([x1|x3]) channel halves that
    match the kernel's fused 2x2 gather order.

    y = LN(x) @ W^T = ((x-mean)*rsqrt(var+eps)) @ (diag(gamma) W^T) + beta @ W^T
    """
    C4 = gamma.shape[0]
    C = C4 // 4
    wt = jnp.transpose(weight).astype(jnp.float32)          # (4C, 2C)
    g32 = gamma.astype(jnp.float32)
    b32 = beta.astype(jnp.float32)

    bias = (b32 @ wt).reshape(1, wt.shape[1])                # (1, 2C), f32
    wg = g32[:, None] * wt                                   # gamma folded in

    # PyTorch channel order of the 4C vector is [x0|x1|x2|x3]; the fused
    # gather produces even-h = [x0|x2], odd-h = [x1|x3].
    idx_e = jnp.concatenate([jnp.arange(0, C), jnp.arange(2 * C, 3 * C)])
    idx_o = jnp.concatenate([jnp.arange(C, 2 * C), jnp.arange(3 * C, 4 * C)])
    # Keep the matmul in the weight's native dtype (bf16 weights -> native MXU).
    w_stack = jnp.stack([wg[idx_e], wg[idx_o]]).astype(weight.dtype)  # (2,2C,2C)
    return w_stack, bias


# ----------------------------------------------------------------------------
# Kernel.
# ----------------------------------------------------------------------------
def _make_kernel(tr, Wo, C2, C4):
    rows = tr * Wo
    inv_c4 = 1.0 / float(C4)

    def kernel(x_ref, w_ref, bias_ref, o_ref):
        # x_ref: (tr, 2, Wo, 2C); [:,0] = even-h rows ([x0|x2]),
        #                          [:,1] = odd-h  rows ([x1|x3]).
        xe = x_ref[:, 0].reshape(rows, C2).astype(jnp.float32)
        xo = x_ref[:, 1].reshape(rows, C2).astype(jnp.float32)

        # LayerNorm statistics over the full 4C channels, split across halves.
        mean = (jnp.sum(xe, axis=-1, keepdims=True)
                + jnp.sum(xo, axis=-1, keepdims=True)) * inv_c4
        xe_c = xe - mean
        xo_c = xo - mean
        var = (jnp.sum(xe_c * xe_c, axis=-1, keepdims=True)
               + jnp.sum(xo_c * xo_c, axis=-1, keepdims=True)) * inv_c4
        inv = jax.lax.rsqrt(var + EPS)

        # Split matmul (same FLOPs as one K=4C pass, no lane concat / relayout).
        w0 = w_ref[0]
        w1 = w_ref[1]
        wdt = w0.dtype
        acc = jnp.dot(xe_c.astype(wdt), w0, preferred_element_type=jnp.float32)
        acc = acc + jnp.dot(xo_c.astype(wdt), w1,
                            preferred_element_type=jnp.float32)

        # rsqrt factors out of the contraction; bias = beta @ W^T.
        o_ref[...] = (acc * inv + bias_ref[...]).astype(o_ref.dtype)

    return kernel


# ----------------------------------------------------------------------------
# Generation-aware VMEM budget & row-tile selection.
# ----------------------------------------------------------------------------
def _vmem_budget_and_limit():
    cap = None
    try:
        info = pltpu.get_tpu_info()
        cap = getattr(info, "vmem_capacity_bytes", None)
    except Exception:
        cap = None
    if cap is None:
        cap = 64 << 20                       # conservative (v7x-sized) fallback
    if cap >= (96 << 20):                    # 128 MiB parts (v5e / v6e)
        return 56 << 20, 100 << 20
    return 28 << 20, 48 << 20                # 64 MiB per TC (v7x)


def _choose_row_tile(R, Wo, C2, C2o, in_isz, w_isz, out_isz, budget,
                     target_rows):
    # tr granularity so that (tr * Wo) % 8 == 0 (output-block sublane rule).
    g = 8 // math.gcd(Wo, 8)

    def est(tr):
        rows = tr * Wo
        return (2 * C2 * C2o * w_isz                 # resident weight (1 buffer)
                + 2 * (2 * rows * C2) * in_isz       # input block, double-buffered
                + 2 * rows * C2o * out_isz           # output block, double-buffered
                + (3 * rows * C2 + 2 * rows * C2o) * 4)  # live f32 temporaries

    def snap(tr):
        tr = max(1, min(tr, R))
        if tr >= R:
            return R                # single step: block rows == full output dim
        tr = (tr // g) * g
        if tr < g:
            tr = g if g <= R else R
        return tr

    tr = snap(max(1, target_rows // max(Wo, 1)))
    # Shrink until the estimate fits the per-generation VMEM budget.
    while tr > g and est(tr) > budget:
        new_tr = snap(tr // 2)
        if new_tr >= tr:
            break
        tr = new_tr

    # Aim for >= 4 grid steps (>= 2 per v7x TensorCore) when tiles stay large
    # enough (>= 256 merged rows keeps per-step overhead amortized on v5e/v6e).
    steps = -(-R // tr)
    if steps < 4:
        cand = snap(R // 4)
        if g <= cand < tr and cand * Wo >= 256 and est(cand) <= budget:
            tr = cand

    # Prefer a tr that divides R (balanced steps, no ragged last tile).
    if 0 < tr < R and R % tr != 0:
        lo = max(g, tr - 16 * g)
        for cand in range(tr - g, lo - 1, -g):
            if cand > 0 and R % cand == 0:
                tr = cand
                break
    return tr


# ----------------------------------------------------------------------------
# Public forward.
# ----------------------------------------------------------------------------
def patch_merging_2d(x, gamma, beta, weight, *, target_rows=1024):
    """Forward pass of PatchMerging2D.

    Args:
      x:      [B, H, W, C]
      gamma:  [4C]      LayerNorm weight
      beta:   [4C]      LayerNorm bias
      weight: [2C, 4C]  nn.Linear(4*dim, 2*dim, bias=False).weight
    Returns:
      [B, H//2, W//2, 2C]
    """
    B, H, W, C = x.shape
    Ho, Wo = H // 2, W // 2
    if (H % 2) or (W % 2):
        # PyTorch SHAPE_FIX path: drop the trailing odd row / column.
        x = x[:, :2 * Ho, :2 * Wo, :]
    C2, C4 = 2 * C, 4 * C

    w_stack, bias = prepare_params(gamma, beta, weight)
    C2o = w_stack.shape[-1]          # == 2C; block covers the full lane dim

    R = B * Ho                       # "super-rows": each holds Wo merged positions
    N = R * Wo
    # Free reshape (identical row-major layout): [B,H,W,C] -> [R, 2, Wo, 2C].
    x_r = x.reshape(R, 2, Wo, C2)

    budget, vmem_limit = _vmem_budget_and_limit()
    tr = _choose_row_tile(R, Wo, C2, C2o, x.dtype.itemsize,
                          w_stack.dtype.itemsize, x.dtype.itemsize,
                          budget, target_rows)
    rows = tr * Wo
    grid = -(-R // tr)

    kernel = _make_kernel(tr, Wo, C2, C4)

    # Constant-index-map blocks (weight / bias) need only a single VMEM buffer.
    def _const_spec(shape):
        idx = lambda i: (0,) * len(shape)
        try:
            return pl.BlockSpec(shape, idx, pipeline_mode=pl.Buffered(1))
        except (AttributeError, TypeError):
            # Older jax without pipeline_mode: fall back to default buffering.
            return pl.BlockSpec(shape, idx)

    out = pl.pallas_call(
        kernel,
        out_shape=jax.ShapeDtypeStruct((N, C2o), x.dtype),
        grid_spec=pltpu.PrefetchScalarGridSpec(
            num_scalar_prefetch=0,
            grid=(grid,),
            in_specs=[
                pl.BlockSpec((tr, 2, Wo, C2), lambda i: (i, 0, 0, 0)),
                _const_spec((2, C2, C2o)),
                _const_spec((1, C2o)),
            ],
            out_specs=pl.BlockSpec((rows, C2o), lambda i: (i, 0)),
        ),
        compiler_params=pltpu.CompilerParams(
            dimension_semantics=("parallel",),
            vmem_limit_bytes=int(vmem_limit)),
    )(x_r, w_stack, bias)

    # Ragged last step: rows >= N are garbage but map only to out-of-bounds
    # output rows, which Pallas discards on writeback (rows are independent),
    # so no in-kernel mask is needed.
    return out.reshape(B, Ho, Wo, C2o)


# ----------------------------------------------------------------------------
# Plain-JAX reference mirroring the PyTorch forward.
# ----------------------------------------------------------------------------
def _reference(x, gamma, beta, weight):
    B, H, W, C = x.shape
    x0 = x[:, 0::2, 0::2, :]
    x1 = x[:, 1::2, 0::2, :]
    x2 = x[:, 0::2, 1::2, :]
    x3 = x[:, 1::2, 1::2, :]
    xc = jnp.concatenate([x0, x1, x2, x3], -1).astype(jnp.float32)
    mean = jnp.mean(xc, -1, keepdims=True)
    var = jnp.mean((xc - mean) ** 2, -1, keepdims=True)
    xn = (xc - mean) * jax.lax.rsqrt(var + EPS) * gamma + beta
    return (xn @ weight.T.astype(jnp.float32)).astype(x.dtype)


if __name__ == "__main__":
    key = jax.random.PRNGKey(0)
    B, H, W, C = 2, 16, 16, 32   # dim=32 -> LayerNorm(128), Linear(128 -> 64)

    kx, kw, kg, kb = jax.random.split(key, 4)
    x = jax.random.normal(kx, (B, H, W, C), dtype=jnp.float32)
    # nn.Linear(4*dim, 2*dim, bias=False).weight has shape (2*dim, 4*dim)
    weight = jax.random.normal(kw, (2 * C, 4 * C), dtype=jnp.float32) * 0.02
    gamma = 1.0 + 0.01 * jax.random.normal(kg, (4 * C,), dtype=jnp.float32)
    beta = 0.01 * jax.random.normal(kb, (4 * C,), dtype=jnp.float32)

    fwd = jax.jit(patch_merging_2d)
    y = jax.block_until_ready(fwd(x, gamma, beta, weight))

    y_ref = _reference(x, gamma, beta, weight)
    assert y.shape == (B, H // 2, W // 2, 2 * C), y.shape
    err = float(jnp.max(jnp.abs(y - y_ref)))
    assert jnp.allclose(y, y_ref, atol=2e-3, rtol=2e-3), f"mismatch {err}"

    print("KERNEL_OK")
</pallas_src>

<mosaic_0001>
module attributes {stable_mosaic.version = 11 : i64} {
  func.func @kernel(%arg0: i32, %arg1: memref<16x2x8x64xf32, #tpu.memory_space<vmem>>, %arg2: memref<2x64x64xf32, #tpu.memory_space<vmem>>, %arg3: memref<1x64xf32, #tpu.memory_space<vmem>>, %arg4: memref<128x64xf32, #tpu.memory_space<vmem>>) attributes {dimension_semantics = [#tpu.dimension_semantics<parallel>], iteration_bounds = array<i64: 1>, scalar_prefetch = 0 : i64, scratch_operands = 0 : i64, tpu.core_type = #tpu.core_type<tc>, window_params = [{transform_indices = @transform_0, window_bounds = array<i64: 16, 2, 8, 64>}, {pipeline_mode = #tpu.pipeline_mode<synchronous>, transform_indices = @transform_1, window_bounds = array<i64: 2, 64, 64>}, {pipeline_mode = #tpu.pipeline_mode<synchronous>, transform_indices = @transform_2, window_bounds = array<i64: 1, 64>}, {transform_indices = @transform_3, window_bounds = array<i64: 128, 64>}]} {
    %c0 = arith.constant 0 : index
    %c0_0 = arith.constant 0 : index
    %c0_1 = arith.constant 0 : index
    %c0_2 = arith.constant 0 : index
    %0 = vector.load %arg1[%c0, %c0_0, %c0_1, %c0_2] : memref<16x2x8x64xf32, #tpu.memory_space<vmem>>, vector<16x1x8x64xf32>
    %1 = vector.shape_cast %0 : vector<16x1x8x64xf32> to vector<16x8x64xf32>
    %2 = vector.shape_cast %1 : vector<16x8x64xf32> to vector<128x64xf32>
    %c0_3 = arith.constant 0 : index
    %c1 = arith.constant 1 : index
    %c0_4 = arith.constant 0 : index
    %c0_5 = arith.constant 0 : index
    %3 = vector.load %arg1[%c0_3, %c1, %c0_4, %c0_5] : memref<16x2x8x64xf32, #tpu.memory_space<vmem>>, vector<16x1x8x64xf32>
    %4 = vector.shape_cast %3 : vector<16x1x8x64xf32> to vector<16x8x64xf32>
    %5 = vector.shape_cast %4 : vector<16x8x64xf32> to vector<128x64xf32>
    %cst = arith.constant dense<0.000000e+00> : vector<128xf32>
    %6 = vector.multi_reduction <add>, %2, %cst [1] : vector<128x64xf32> to vector<128xf32>
    %7 = vector.shape_cast %6 : vector<128xf32> to vector<128x1xf32>
    %cst_6 = arith.constant dense<0.000000e+00> : vector<128xf32>
    %8 = vector.multi_reduction <add>, %5, %cst_6 [1] : vector<128x64xf32> to vector<128xf32>
    %9 = vector.shape_cast %8 : vector<128xf32> to vector<128x1xf32>
    %10 = arith.addf %7, %9 : vector<128x1xf32>
    %cst_7 = arith.constant 7.812500e-03 : f32
    %11 = vector.broadcast %cst_7 : f32 to vector<128x1xf32>
    %12 = arith.mulf %10, %11 : vector<128x1xf32>
    %13 = vector.broadcast %12 : vector<128x1xf32> to vector<128x64xf32>
    %14 = arith.subf %2, %13 : vector<128x64xf32>
    %15 = vector.broadcast %12 : vector<128x1xf32> to vector<128x64xf32>
    %16 = arith.subf %5, %15 : vector<128x64xf32>
    %17 = arith.mulf %14, %14 : vector<128x64xf32>
    %cst_8 = arith.constant dense<0.000000e+00> : vector<128xf32>
    %18 = vector.multi_reduction <add>, %17, %cst_8 [1] : vector<128x64xf32> to vector<128xf32>
    %19 = vector.shape_cast %18 : vector<128xf32> to vector<128x1xf32>
    %20 = arith.mulf %16, %16 : vector<128x64xf32>
    %cst_9 = arith.constant dense<0.000000e+00> : vector<128xf32>
    %21 = vector.multi_reduction <add>, %20, %cst_9 [1] : vector<128x64xf32> to vector<128xf32>
    %22 = vector.shape_cast %21 : vector<128xf32> to vector<128x1xf32>
    %23 = arith.addf %19, %22 : vector<128x1xf32>
    %cst_10 = arith.constant 7.812500e-03 : f32
    %24 = vector.broadcast %cst_10 : f32 to vector<128x1xf32>
    %25 = arith.mulf %23, %24 : vector<128x1xf32>
    %cst_11 = arith.constant 9.99999974E-6 : f32
    %26 = vector.broadcast %cst_11 : f32 to vector<128x1xf32>
    %27 = arith.addf %25, %26 : vector<128x1xf32>
    %28 = math.rsqrt %27 : vector<128x1xf32>
    %c0_12 = arith.constant 0 : index
    %c0_13 = arith.constant 0 : index
    %c0_14 = arith.constant 0 : index
    %29 = vector.load %arg2[%c0_12, %c0_13, %c0_14] : memref<2x64x64xf32, #tpu.memory_space<vmem>>, vector<1x64x64xf32>
    %30 = vector.shape_cast %29 : vector<1x64x64xf32> to vector<64x64xf32>
    %c1_15 = arith.constant 1 : index
    %c0_16 = arith.constant 0 : index
    %c0_17 = arith.constant 0 : index
    %31 = vector.load %arg2[%c1_15, %c0_16, %c0_17] : memref<2x64x64xf32, #tpu.memory_space<vmem>>, vector<1x64x64xf32>
    %32 = vector.shape_cast %31 : vector<1x64x64xf32> to vector<64x64xf32>
    %cst_18 = arith.constant dense<0.000000e+00> : vector<128x64xf32>
    %33 = tpu.matmul %14, %30, %cst_18 {dimension_numbers = #tpu.dot_dimension_numbers<[1], [0], [0], [1], [0, 0, 1, 1], [], []>} : vector<128x64xf32>, vector<64x64xf32>, vector<128x64xf32> -> vector<128x64xf32>
    %cst_19 = arith.constant dense<0.000000e+00> : vector<128x64xf32>
    %34 = tpu.matmul %16, %32, %cst_19 {dimension_numbers = #tpu.dot_dimension_numbers<[1], [0], [0], [1], [0, 0, 1, 1], [], []>} : vector<128x64xf32>, vector<64x64xf32>, vector<128x64xf32> -> vector<128x64xf32>
    %35 = arith.addf %33, %34 : vector<128x64xf32>
    %36 = vector.broadcast %28 : vector<128x1xf32> to vector<128x64xf32>
    %37 = arith.mulf %35, %36 : vector<128x64xf32>
    %c0_20 = arith.constant 0 : index
    %c0_21 = arith.constant 0 : index
    %38 = vector.load %arg3[%c0_20, %c0_21] : memref<1x64xf32, #tpu.memory_space<vmem>>, vector<1x64xf32>
    %39 = vector.broadcast %38 : vector<1x64xf32> to vector<128x64xf32>
    %40 = arith.addf %37, %39 : vector<128x64xf32>
    %c0_22 = arith.constant 0 : index
    %c0_23 = arith.constant 0 : index
    %41 = vector.load %arg4[%c0_22, %c0_23] : memref<128x64xf32, #tpu.memory_space<vmem>>, vector<128x64xf32>
    tpu.vector_store %arg4[%c0_22, %c0_23], %40 {strides = array<i32>} : memref<128x64xf32, #tpu.memory_space<vmem>>, vector<128x64xf32>,
    return
  }
  func.func @transform_0(%arg0: i32) -> (i32, i32, i32, i32) {
    %c0_i32 = arith.constant 0 : i32
    %c0_i32_0 = arith.constant 0 : i32
    %c0_i32_1 = arith.constant 0 : i32
    %c0_i32_2 = arith.constant 0 : i32
    return %arg0, %c0_i32, %c0_i32_0, %c0_i32_1 : i32, i32, i32, i32
  }
  func.func @transform_1(%arg0: i32) -> (i32, i32, i32) {
    %c0_i32 = arith.constant 0 : i32
    %c0_i32_0 = arith.constant 0 : i32
    %c0_i32_1 = arith.constant 0 : i32
    %c0_i32_2 = arith.constant 0 : i32
    return %c0_i32, %c0_i32_0, %c0_i32_1 : i32, i32, i32
  }
  func.func @transform_2(%arg0: i32) -> (i32, i32) {
    %c0_i32 = arith.constant 0 : i32
    %c0_i32_0 = arith.constant 0 : i32
    %c0_i32_1 = arith.constant 0 : i32
    return %c0_i32, %c0_i32_0 : i32, i32
  }
  func.func @transform_3(%arg0: i32) -> (i32, i32) {
    %c0_i32 = arith.constant 0 : i32
    %c0_i32_0 = arith.constant 0 : i32
    return %arg0, %c0_i32 : i32, i32
  }
}

</mosaic_0001>

<bundles_post_ra>
// kernel: patch_merging_2d.1
= control target key start
LH: loop header
LB: loop body
LE: loop exit
PB: predicated region body
PF: predicated region fallthrough
CT: control target
= control target key end

     0   :  { %vm48_vm0 = vcmask 523264   ;;  %s1645_s0 = inlined_call_operand.vmem [shape: f32[16,2,8,64], index: 0, kind: input, shape index: {}]   ;;  %s1646_s1 = inlined_call_operand.vmem [shape: f32[2,64,64], index: 1, kind: input, shape index: {}]   ;;  %s1647_s2 = inlined_call_operand.vmem [shape: f32[1,64], index: 2, kind: input, shape index: {}]   ;;  %s1648_s3 = inlined_call_operand.hbm [shape: f32[128,64], index: 3, kind: output, shape index: {}]  }
   0x1   :  { %v1143_v0 = vld [vmem:[%s1645_s0 + $0x10] sm:$0xff]  ;;  %v1148_v1 = vld [vmem:[%s1645_s0] sm:$0xff]  ;;  %v1153_v2 = vld [vmem:[%s1645_s0 + $0x18] sm:$0xff] }
   0x2   :  { %v52_v3 = vsel %vm48_vm0, %v1143_v0, 0.0  ;;  %v49_v4 = vsel %vm48_vm0, %v1148_v1, 0.0  ;;  %v1162_v5 = vld [vmem:[%s1645_s0 + $0x8] sm:$0xff]  ;;  %v100_v6 = vsel %vm48_vm0, %v1153_v2, 0.0  ;;  %v1176_v9 = vld [vmem:[%s1645_s0 + $0x20] sm:$0xff]  ;;  %v1185_v12 = vld [vmem:[%s1645_s0 + $0x38] sm:$0xff] }
   0x3   :  { %53 = vadd.xlane.f32.xlu1 %v52_v3  ;;  %50 = vadd.xlane.f32.xlu0 %v49_v4  ;;  %v97_v7 = vsel %vm48_vm0, %v1162_v5, 0.0  ;;  %v1171_v8 = vld [vmem:[%s1645_s0 + $0x28] sm:$0xff]  ;;  %v55_v11 = vsel %vm48_vm0, %v1176_v9, 0.0  ;;  %v1190_v13 = vld [vmem:[%s1645_s0 + $0x30] sm:$0xff]  ;;  %v898_v14 = vld [vmem:[%s1646_s1 + $0x78] sm:$0xff]  ;;  %v106_v15 = vsel %vm48_vm0, %v1185_v12, 0.0 }
   0x4   :  { %v103_v10 = vsel %vm48_vm0, %v1171_v8, 0.0  ;;  %v58_v16 = vsel %vm48_vm0, %v1190_v13, 0.0  ;;  %980 = vmatprep.subr.mxu0 %v898_v14  ;;  %v408_v17 = vld [vmem:[%s1646_s1 + $0x38] sm:$0xff]  ;;  %v897_v18 = vld [vmem:[%s1646_s1 + $0x70] sm:$0xff]  ;;  %v1208_v19 = vld [vmem:[%s1645_s0 + $0x48] sm:$0xff] }
   0x5   :  { %v1213_v20 = vld [vmem:[%s1645_s0 + $0x40] sm:$0xff]  ;;  %1020 = vmatprep.subr.mxu1 %v408_v17  ;;  %981 = vmatpush3.msra.mxu0 %v898_v14  ;;  %v407_v21 = vld [vmem:[%s1646_s1 + $0x30] sm:$0xff]  ;;  %v896_v22 = vld [vmem:[%s1646_s1 + $0x68] sm:$0xff] }
   0x6   :  { %1021 = vmatpush3.msra.mxu1 %v408_v17  ;;  %982 = vmatprep.subr.mxu0 %v897_v18  ;;  %v406_v23 = vld [vmem:[%s1646_s1 + $0x28] sm:$0xff] }
   0x7   :  { %101 = vadd.xlane.f32.xlu1 %v100_v6  ;;  %98 = vadd.xlane.f32.xlu0 %v97_v7 }
   0xb   :  { %104 = vadd.xlane.f32.xlu1 %v103_v10  ;;  %56 = vadd.xlane.f32.xlu0 %v55_v11 }
   0xf   :  { %107 = vadd.xlane.f32.xlu1 %v106_v15  ;;  %59 = vadd.xlane.f32.xlu0 %v58_v16 }
  0x10   :  { %8 = vsyncpa [#allocation3], 0  ;;  %v109_v24 = vsel %vm48_vm0, %v1208_v19, 0.0  ;;  %v61_v25 = vsel %vm48_vm0, %v1213_v20, 0.0  ;;  %1022 = vmatprep.subr.mxu1 %v407_v21  ;;  %983 = vmatpush3.msra.mxu0 %v897_v18  ;;  %v1231_v26 = vld [vmem:[%s1645_s0 + $0x58] sm:$0xff]  ;;  %v1236_v27 = vld [vmem:[%s1645_s0 + $0x50] sm:$0xff] }
  0x11   :  { %1023 = vmatpush3.msra.mxu1 %v407_v21  ;;  %984 = vmatprep.subr.mxu0 %v896_v22  ;;  %v895_v28 = vld [vmem:[%s1646_s1 + $0x60] sm:$0xff]  ;;  %v894_v30 = vld [vmem:[%s1646_s1 + $0x58] sm:$0xff]  ;;  %v112_v31 = vsel %vm48_vm0, %v1231_v26, 0.0  ;;  %v64_v32 = vsel %vm48_vm0, %v1236_v27, 0.0  ;;  %v1254_v33 = vld [vmem:[%s1645_s0 + $0x68] sm:$0xff] }
  0x12   :  { %1024 = vmatprep.subr.mxu1 %v406_v23  ;;  %985 = vmatpush3.msra.mxu0 %v896_v22  ;;  %v405_v29 = vld [vmem:[%s1646_s1 + $0x20] sm:$0xff]  ;;  %v404_v35 = vld [vmem:[%s1646_s1 + $0x18] sm:$0xff]  ;;  %v893_v36 = vld [vmem:[%s1646_s1 + $0x50] sm:$0xff]  ;;  %v115_v38 = vsel %vm48_vm0, %v1254_v33, 0.0 }
  0x13   :  { %110 = vadd.xlane.f32.xlu1 %v109_v24  ;;  %62 = vadd.xlane.f32.xlu0 %v61_v25  ;;  %v1259_v34 = vld [vmem:[%s1645_s0 + $0x60] sm:$0xff]  ;;  %v403_v37 = vld [vmem:[%s1646_s1 + $0x10] sm:$0xff]  ;;  %v1277_v40 = vld [vmem:[%s1645_s0 + $0x78] sm:$0xff] }
  0x14   :  { %1025 = vmatpush3.msra.mxu1 %v406_v23  ;;  %986 = vmatprep.subr.mxu0 %v895_v28  ;;  %v67_v39 = vsel %vm48_vm0, %v1259_v34, 0.0  ;;  %v1282_v41 = vld [vmem:[%s1645_s0 + $0x70] sm:$0xff]  ;;  %v892_v42 = vld [vmem:[%s1646_s1 + $0x48] sm:$0xff]  ;;  %v891_v44 = vld [vmem:[%s1646_s1 + $0x40] sm:$0xff]  ;;  %v118_v45 = vsel %vm48_vm0, %v1277_v40, 0.0 }
  0x15   :  { %1026 = vmatprep.subr.mxu1 %v405_v29  ;;  %987 = vmatpush3.msra.mxu0 %v895_v28  ;;  %v402_v43 = vld [vmem:[%s1646_s1 + $0x8] sm:$0xff]  ;;  %v70_v46 = vsel %vm48_vm0, %v1282_v41, 0.0  ;;  %v1305_v48 = vld [vmem:[%s1645_s0 + $0x80] sm:$0xff]  ;;  %v1317_v52 = vld [vmem:[%s1645_s0 + $0x98] sm:$0xff] }
  0x16   :  { %1027 = vmatpush3.msra.mxu1 %v405_v29  ;;  %988 = vmatprep.subr.mxu0 %v894_v30  ;;  %v1300_v47 = vld [vmem:[%s1645_s0 + $0x88] sm:$0xff]  ;;  %v401_v49 = vld [vmem:[%s1646_s1] sm:$0xff]  ;;  %v73_v51 = vsel %vm48_vm0, %v1305_v48, 0.0  ;;  %v1322_v53 = vld [vmem:[%s1645_s0 + $0x90] sm:$0xff]  ;;  %v124_v54 = vsel %vm48_vm0, %v1317_v52, 0.0 }
  0x17   :  { %113 = vadd.xlane.f32.xlu1 %v112_v31  ;;  %65 = vadd.xlane.f32.xlu0 %v64_v32  ;;  %v121_v50 = vsel %vm48_vm0, %v1300_v47, 0.0  ;;  %v76_v55 = vsel %vm48_vm0, %v1322_v53, 0.0  ;;  %v1331_v56 = vld [vmem:[%s1645_s0 + $0xa8] sm:$0xff]  ;;  %v1336_v57 = vld [vmem:[%s1645_s0 + $0xa0] sm:$0xff]  ;;  %v1345_v60 = vld [vmem:[%s1645_s0 + $0xb8] sm:$0xff] }
  0x18   :  { %1028 = vmatprep.subr.mxu1 %v404_v35  ;;  %989 = vmatpush3.msra.mxu0 %v894_v30  ;;  %v127_v58 = vsel %vm48_vm0, %v1331_v56, 0.0  ;;  %v79_v59 = vsel %vm48_vm0, %v1336_v57, 0.0  ;;  %v1350_v61 = vld [vmem:[%s1645_s0 + $0xb0] sm:$0xff]  ;;  %v130_v62 = vsel %vm48_vm0, %v1345_v60, 0.0  ;;  %v1359_v3 = vld [vmem:[%s1645_s0 + $0xc8] sm:$0xff]  ;;  %v1364_v4 = vld [vmem:[%s1645_s0 + $0xc0] sm:$0xff] }
  0x19   :  { %1029 = vmatpush3.msra.mxu1 %v404_v35  ;;  %990 = vmatprep.subr.mxu0 %v893_v36  ;;  %v82_v63 = vsel %vm48_vm0, %v1350_v61, 0.0  ;;  %v133_v6 = vsel %vm48_vm0, %v1359_v3, 0.0  ;;  %v85_v7 = vsel %vm48_vm0, %v1364_v4, 0.0  ;;  %v1373_v10 = vld [vmem:[%s1645_s0 + $0xd8] sm:$0xff]  ;;  %v1378_v11 = vld [vmem:[%s1645_s0 + $0xd0] sm:$0xff]  ;;  %v1387_v16 = vld [vmem:[%s1645_s0 + $0xe8] sm:$0xff] }
  0x1a   :  { %1030 = vmatprep.subr.mxu1 %v403_v37  ;;  %991 = vmatpush3.msra.mxu0 %v893_v36  ;;  %v136_v14 = vsel %vm48_vm0, %v1373_v10, 0.0  ;;  %v88_v15 = vsel %vm48_vm0, %v1378_v11, 0.0  ;;  %v1392_v17 = vld [vmem:[%s1645_s0 + $0xe0] sm:$0xff]  ;;  %v139_v18 = vsel %vm48_vm0, %v1387_v16, 0.0  ;;  %v1401_v22 = vld [vmem:[%s1645_s0 + $0xf8] sm:$0xff]  ;;  %v1406_v23 = vld [vmem:[%s1645_s0 + $0xf0] sm:$0xff] }
  0x1b   :  { %116 = vadd.xlane.f32.xlu1 %v115_v38  ;;  %68 = vadd.xlane.f32.xlu0 %v67_v39  ;;  %v91_v21 = vsel %vm48_vm0, %v1392_v17, 0.0  ;;  %v142_v24 = vsel %vm48_vm0, %v1401_v22, 0.0  ;;  %v94_v25 = vsel %vm48_vm0, %v1406_v23, 0.0 }
  0x1c   :  { %1031 = vmatpush3.msra.mxu1 %v403_v37  ;;  %992 = vmatprep.subr.mxu0 %v892_v42 }
  0x1d   :  { %1032 = vmatprep.subr.mxu1 %v402_v43  ;;  %993 = vmatpush3.msra.mxu0 %v892_v42 }
  0x1e   :  { %1033 = vmatpush3.msra.mxu1 %v402_v43  ;;  %994 = vmatprep.subr.mxu0 %v891_v44 }
  0x1f   :  { %119 = vadd.xlane.f32.xlu1 %v118_v45  ;;  %71 = vadd.xlane.f32.xlu0 %v70_v46 }
  0x20   :  { %1034 = vmatprep.subr.mxu1 %v401_v49  ;;  %995 = vmatpush3.msra.mxu0 %v891_v44 }
  0x21   :  { %1035 = vmatpush3.msra.mxu1 %v401_v49 }
  0x23   :  { %122 = vadd.xlane.f32.xlu1 %v121_v50  ;;  %74 = vadd.xlane.f32.xlu0 %v73_v51 }
  0x27   :  { %125 = vadd.xlane.f32.xlu1 %v124_v54  ;;  %77 = vadd.xlane.f32.xlu0 %v76_v55 }
  0x2b   :  { %128 = vadd.xlane.f32.xlu1 %v127_v58  ;;  %80 = vadd.xlane.f32.xlu0 %v79_v59 }
  0x2f   :  { %131 = vadd.xlane.f32.xlu1 %v130_v62  ;;  %83 = vadd.xlane.f32.xlu0 %v82_v63 }
  0x33   :  { %134 = vadd.xlane.f32.xlu1 %v133_v6  ;;  %86 = vadd.xlane.f32.xlu0 %v85_v7 }
  0x37   :  { %137 = vadd.xlane.f32.xlu1 %v136_v14  ;;  %89 = vadd.xlane.f32.xlu0 %v88_v15 }
  0x3b   :  { %140 = vadd.xlane.f32.xlu1 %v139_v18  ;;  %92 = vadd.xlane.f32.xlu0 %v91_v21 }
  0x3f   :  { %143 = vadd.xlane.f32.xlu1 %v142_v24  ;;  %95 = vadd.xlane.f32.xlu0 %v94_v25 }
  0x8c   :  { %v54_v28 = vpop.xlane.xlu1 %53  ;;  %v51_v29 = vpop.xlane.xlu0 %50 }
  0x90   :  { %v102_v30 = vpop.xlane.xlu1 %101  ;;  %v99_v31 = vpop.xlane.xlu0 %98 }
  0x91   :  { %v146_v32 = vadd.f32 %v102_v30, %v54_v28  ;;  %v145_v35 = vadd.f32 %v99_v31, %v51_v29 }
  0x93   :  { %v162_v36 = vmul.f32 0.0078125, %v146_v32  ;;  %v161_v37 = vmul.f32 0.0078125, %v145_v35 }
  0x94   :  { %v105_v38 = vpop.xlane.xlu1 %104  ;;  %v57_v39 = vpop.xlane.xlu0 %56 }
  0x95   :  { %v178_v42 = vsub.f32 %v1143_v0, %v162_v36  ;;  %v1414_v43 = vsub.f32 %v1153_v2, %v162_v36  ;;  %v147_v44 = vadd.f32 %v105_v38, %v57_v39  ;;  %v1417_v45 = vsub.f32 %v1162_v5, %v161_v37 }
  0x96   :  { %v177_v46 = vsub.f32 %v1148_v1, %v161_v37 }
  0x97   :  { %v163_v49 = vmul.f32 0.0078125, %v147_v44  ;;  %996 = vmatprep.mubr.msk.f32.mxu0 %vm48_vm0, %v1417_v45  ;;  %v210_v50 = vmul.f32 %v178_v42, %v178_v42 }
  0x98   :  { %1036 = vmatprep.mubr.msk.f32.mxu1 %vm48_vm0, %v177_v46  ;;  %v108_v51 = vpop.xlane.xlu1 %107  ;;  %997 = vmatmul.mubr.msk.f32.vlgmr.msra.gmra.mxu0 %vm48_vm0, %v1414_v43  ;;  %v60_v0 = vpop.xlane.xlu0 %59  ;;  %v209_v2 = vmul.f32 %v177_v46, %v177_v46 }
  0x99   :  { %v179_v54 = vsub.f32 %v1176_v9, %v163_v49  ;;  %v1427_v5 = vsub.f32 %v1171_v8, %v163_v49  ;;  %1037 = vmatmul.mubr.msk.f32.vlgmr.msra.gmra.mxu1 %vm48_vm0, %v178_v42  ;;  %v148_v1 = vadd.f32 %v108_v51, %v60_v0  ;;  %v228_v55 = vsel %vm48_vm0, %v210_v50, 0.0 }
  0x9a   :  { %229 = vadd.xlane.f32.xlu1 %v228_v55  ;;  %v225_v58 = vsel %vm48_vm0, %v209_v2, 0.0 }
  0x9b   :  { %v164_v59 = vmul.f32 0.0078125, %v148_v1  ;;  %226 = vadd.xlane.f32.xlu0 %v225_v58  ;;  %999 = vmatprep.mubr.msk.f32.mxu0 %vm48_vm0, %v1427_v5  ;;  %v211_v62 = vmul.f32 %v179_v54, %v179_v54 }
  0x9c   :  { %1039 = vmatprep.mubr.msk.f32.mxu1 %vm48_vm0, %v179_v54  ;;  %v111_v9 = vpop.xlane.xlu1 %110  ;;  %v63_v63 = vpop.xlane.xlu0 %62 }
  0x9d   :  { %v180_v8 = vsub.f32 %v1190_v13, %v164_v59  ;;  %v1437_v6 = vsub.f32 %v1185_v12, %v164_v59  ;;  %v149_v7 = vadd.f32 %v111_v9, %v63_v63  ;;  %v231_v14 = vsel %vm48_vm0, %v211_v62, 0.0 }
  0x9f   :  { %v165_v15 = vmul.f32 0.0078125, %v149_v7  ;;  %232 = vadd.xlane.f32.xlu0 %v231_v14  ;;  %1000 = vmatmul.mubr.msk.f32.gmra.mxu0 %vm48_vm0, %v1437_v6  ;;  %v212_v18 = vmul.f32 %v180_v8, %v180_v8 }
  0xa0   :  { %1040 = vmatmul.mubr.msk.f32.gmra.mxu1 %vm48_vm0, %v180_v8  ;;  %v114_v21 = vpop.xlane.xlu1 %113  ;;  %v66_v24 = vpop.xlane.xlu0 %65 }
  0xa1   :  { %v181_v25 = vsub.f32 %v1213_v20, %v165_v15  ;;  %v1445_v13 = vsub.f32 %v1208_v19, %v165_v15  ;;  %v150_v12 = vadd.f32 %v114_v21, %v66_v24  ;;  %v234_v28 = vsel %vm48_vm0, %v212_v18, 0.0 }
  0xa2   :  { %235 = vadd.xlane.f32.xlu1 %v234_v28 }
  0xa3   :  { %v166_v29 = vmul.f32 0.0078125, %v150_v12  ;;  %1002 = vmatprep.mubr.msk.f32.mxu0 %vm48_vm0, %v1445_v13  ;;  %1042 = vmatprep.mubr.msk.f32.mxu1 %vm48_vm0, %v181_v25  ;;  %v213_v30 = vmul.f32 %v181_v25, %v181_v25 }
  0xa4   :  { %v117_v31 = vpop.xlane.xlu1 %116  ;;  %v69_v32 = vpop.xlane.xlu0 %68 }
  0xa5   :  { %v182_v35 = vsub.f32 %v1236_v27, %v166_v29  ;;  %v1453_v20 = vsub.f32 %v1231_v26, %v166_v29  ;;  %v151_v19 = vadd.f32 %v117_v31, %v69_v32  ;;  %v237_v36 = vsel %vm48_vm0, %v213_v30, 0.0 }
  0xa6   :  { %238 = vadd.xlane.f32.xlu0 %v237_v36 }
  0xa7   :  { %v167_v37 = vmul.f32 0.0078125, %v151_v19  ;;  %1003 = vmatmul.mubr.msk.f32.gmra.mxu0 %vm48_vm0, %v1453_v20  ;;  %1043 = vmatmul.mubr.msk.f32.gmra.mxu1 %vm48_vm0, %v182_v35  ;;  %v214_v38 = vmul.f32 %v182_v35, %v182_v35 }
  0xa8   :  { %v120_v39 = vpop.xlane.xlu1 %119  ;;  %v72_v42 = vpop.xlane.xlu0 %71 }
  0xa9   :  { %v183_v44 = vsub.f32 %v1259_v34, %v167_v37  ;;  %v1461_v27 = vsub.f32 %v1254_v33, %v167_v37  ;;  %v152_v26 = vadd.f32 %v120_v39, %v72_v42  ;;  %v240_v46 = vsel %vm48_vm0, %v214_v38, 0.0 }
  0xaa   :  { %241 = vadd.xlane.f32.xlu1 %v240_v46 }
  0xab   :  { %v168_v49 = vmul.f32 0.0078125, %v152_v26  ;;  %1005 = vmatprep.mubr.msk.f32.mxu0 %vm48_vm0, %v1461_v27  ;;  %1045 = vmatprep.mubr.msk.f32.mxu1 %vm48_vm0, %v183_v44  ;;  %v215_v50 = vmul.f32 %v183_v44, %v183_v44 }
  0xac   :  { %v123_v51 = vpop.xlane.xlu1 %122  ;;  %v75_v0 = vpop.xlane.xlu0 %74 }
  0xad   :  { %v184_v2 = vsub.f32 %v1282_v41, %v168_v49  ;;  %v1469_v34 = vsub.f32 %v1277_v40, %v168_v49  ;;  %v153_v33 = vadd.f32 %v123_v51, %v75_v0  ;;  %v243_v54 = vsel %vm48_vm0, %v215_v50, 0.0 }
  0xae   :  { %244 = vadd.xlane.f32.xlu0 %v243_v54 }
  0xaf   :  { %v169_v1 = vmul.f32 0.0078125, %v153_v33  ;;  %1006 = vmatmul.mubr.msk.f32.gmra.mxu0 %vm48_vm0, %v1469_v34  ;;  %1046 = vmatmul.mubr.msk.f32.gmra.mxu1 %vm48_vm0, %v184_v2  ;;  %v216_v55 = vmul.f32 %v184_v2, %v184_v2 }
  0xb0   :  { %v126_v58 = vpop.xlane.xlu1 %125  ;;  %v78_v59 = vpop.xlane.xlu0 %77 }
  0xb1   :  { %v185_v62 = vsub.f32 %v1305_v48, %v169_v1  ;;  %v1477_v41 = vsub.f32 %v1300_v47, %v169_v1  ;;  %v154_v40 = vadd.f32 %v126_v58, %v78_v59  ;;  %v246_v9 = vsel %vm48_vm0, %v216_v55, 0.0 }
  0xb2   :  { %247 = vadd.xlane.f32.xlu1 %v246_v9 }
  0xb3   :  { %v170_v63 = vmul.f32 0.0078125, %v154_v40  ;;  %1008 = vmatprep.mubr.msk.f32.mxu0 %vm48_vm0, %v1477_v41  ;;  %1048 = vmatprep.mubr.msk.f32.mxu1 %vm48_vm0, %v185_v62  ;;  %v217_v8 = vmul.f32 %v185_v62, %v185_v62 }
  0xb4   :  { %v129_v7 = vpop.xlane.xlu1 %128  ;;  %v81_v14 = vpop.xlane.xlu0 %80 }
  0xb5   :  { %v186_v15 = vsub.f32 %v1322_v53, %v170_v63  ;;  %v1485_v48 = vsub.f32 %v1317_v52, %v170_v63  ;;  %v155_v47 = vadd.f32 %v129_v7, %v81_v14  ;;  %v249_v18 = vsel %vm48_vm0, %v217_v8, 0.0 }
  0xb6   :  { %250 = vadd.xlane.f32.xlu0 %v249_v18  ;;  %v276_v18 = vmul.f32 %v1437_v6, %v1437_v6  ;;  %v281_v6 = vmul.f32 %v1477_v41, %v1477_v41 }
  0xb7   :  { %v171_v21 = vmul.f32 0.0078125, %v155_v47  ;;  %1009 = vmatmul.mubr.msk.f32.gmra.mxu0 %vm48_vm0, %v1485_v48  ;;  %1049 = vmatmul.mubr.msk.f32.gmra.mxu1 %vm48_vm0, %v186_v15  ;;  %v218_v24 = vmul.f32 %v186_v15, %v186_v15  ;;  %v277_v47 = vmul.f32 %v1445_v13, %v1445_v13 }
  0xb8   :  { %v132_v25 = vpop.xlane.xlu1 %131  ;;  %v84_v12 = vpop.xlane.xlu0 %83 }
  0xb9   :  { %v187_v28 = vsub.f32 %v1336_v57, %v171_v21  ;;  %v1493_v53 = vsub.f32 %v1331_v56, %v171_v21  ;;  %v156_v52 = vadd.f32 %v132_v25, %v84_v12  ;;  %v252_v29 = vsel %vm48_vm0, %v218_v24, 0.0 }
  0xba   :  { %253 = vadd.xlane.f32.xlu1 %v252_v29  ;;  %v301_v21 = vsel %vm48_vm0, %v277_v47, 0.0  ;;  %v278_v24 = vmul.f32 %v1453_v20, %v1453_v20  ;;  %v280_v12 = vmul.f32 %v1469_v34, %v1469_v34 }
  0xbb   :  { %v172_v30 = vmul.f32 0.0078125, %v156_v52  ;;  %1011 = vmatprep.mubr.msk.f32.mxu0 %vm48_vm0, %v1493_v53  ;;  %1051 = vmatprep.mubr.msk.f32.mxu1 %vm48_vm0, %v187_v28  ;;  %v219_v31 = vmul.f32 %v187_v28, %v187_v28  ;;  %v313_v28 = vsel %vm48_vm0, %v281_v6, 0.0  ;;  %v283_v20 = vmul.f32 %v1493_v53, %v1493_v53 }
  0xbc   :  { %v135_v32 = vpop.xlane.xlu1 %134  ;;  %v87_v35 = vpop.xlane.xlu0 %86  ;;  %v304_v13 = vsel %vm48_vm0, %v278_v24, 0.0  ;;  %v282_v52 = vmul.f32 %v1485_v48, %v1485_v48 }
  0xbd   :  { %v188_v19 = vsub.f32 %v1350_v61, %v172_v30  ;;  %v1501_v57 = vsub.f32 %v1345_v60, %v172_v30  ;;  %v157_v56 = vadd.f32 %v135_v32, %v87_v35  ;;  %v255_v36 = vsel %vm48_vm0, %v219_v31, 0.0 }
  0xbe   :  { %256 = vadd.xlane.f32.xlu0 %v255_v36  ;;  %v319_v29 = vsel %vm48_vm0, %v283_v20, 0.0  ;;  %v316_v41 = vsel %vm48_vm0, %v282_v52, 0.0 }
  0xbf   :  { %v173_v37 = vmul.f32 0.0078125, %v157_v56  ;;  %1012 = vmatmul.mubr.msk.f32.gmra.mxu0 %vm48_vm0, %v1501_v57  ;;  %1052 = vmatmul.mubr.msk.f32.gmra.mxu1 %vm48_vm0, %v188_v19  ;;  %v220_v38 = vmul.f32 %v188_v19, %v188_v19  ;;  %v284_v30 = vmul.f32 %v1501_v57, %v1501_v57 }
  0xc0   :  { %v138_v39 = vpop.xlane.xlu1 %137  ;;  %v90_v42 = vpop.xlane.xlu0 %89 }
  0xc1   :  { %v189_v44 = vsub.f32 %v1364_v4, %v173_v37  ;;  %v1509_v61 = vsub.f32 %v1359_v3, %v173_v37  ;;  %v158_v60 = vadd.f32 %v138_v39, %v90_v42  ;;  %v258_v26 = vsel %vm48_vm0, %v220_v38, 0.0 }
  0xc2   :  { %259 = vadd.xlane.f32.xlu1 %v258_v26  ;;  %v322_v53 = vsel %vm48_vm0, %v284_v30, 0.0 }
  0xc3   :  { %v174_v46 = vmul.f32 0.0078125, %v158_v60  ;;  %1014 = vmatprep.mubr.msk.f32.mxu0 %vm48_vm0, %v1509_v61  ;;  %1054 = vmatprep.mubr.msk.f32.mxu1 %vm48_vm0, %v189_v44  ;;  %v221_v49 = vmul.f32 %v189_v44, %v189_v44  ;;  %v285_v34 = vmul.f32 %v1509_v61, %v1509_v61 }
  0xc4   :  { %v141_v50 = vpop.xlane.xlu1 %140  ;;  %v93_v51 = vpop.xlane.xlu0 %92 }
  0xc5   :  { %v190_v0 = vsub.f32 %v1378_v11, %v174_v46  ;;  %v1517_v4 = vsub.f32 %v1373_v10, %v174_v46  ;;  %v159_v3 = vadd.f32 %v141_v50, %v93_v51  ;;  %v261_v2 = vsel %vm48_vm0, %v221_v49, 0.0 }
  0xc6   :  { %262 = vadd.xlane.f32.xlu0 %v261_v2  ;;  %v325_v31 = vsel %vm48_vm0, %v285_v34, 0.0 }
  0xc7   :  { %v175_v33 = vmul.f32 0.0078125, %v159_v3  ;;  %1015 = vmatmul.mubr.msk.f32.gmra.mxu0 %vm48_vm0, %v1517_v4  ;;  %1055 = vmatmul.mubr.msk.f32.gmra.mxu1 %vm48_vm0, %v190_v0  ;;  %v222_v54 = vmul.f32 %v190_v0, %v190_v0  ;;  %v286_v48 = vmul.f32 %v1517_v4, %v1517_v4 }
  0xc8   :  { %v144_v1 = vpop.xlane.xlu1 %143  ;;  %v96_v55 = vpop.xlane.xlu0 %95 }
  0xc9   :  { %v191_v58 = vsub.f32 %v1392_v17, %v175_v33  ;;  %v207_v11 = vsub.f32 %v1387_v16, %v175_v33  ;;  %v160_v59 = vadd.f32 %v144_v1, %v96_v55  ;;  %v264_v10 = vsel %vm48_vm0, %v222_v54, 0.0 }
  0xca   :  { %265 = vadd.xlane.f32.xlu1 %v264_v10  ;;  %v273_v17 = vmul.f32 %v1417_v45, %v1417_v45  ;;  %v328_v19 = vsel %vm48_vm0, %v286_v48, 0.0 }
  0xcb   :  { %v176_v62 = vmul.f32 0.0078125, %v160_v59  ;;  %1017 = vmatprep.mubr.msk.f32.mxu0 %vm48_vm0, %v207_v11  ;;  %1057 = vmatprep.mubr.msk.f32.mxu1 %vm48_vm0, %v191_v58  ;;  %v223_v40 = vmul.f32 %v191_v58, %v191_v58  ;;  %v287_v32 = vmul.f32 %v207_v11, %v207_v11 }
  0xcc   :  { %v289_v7 = vsel %vm48_vm0, %v273_v17, 0.0 }
  0xcd   :  { %v192_v9 = vsub.f32 %v1406_v23, %v176_v62  ;;  %v208_v63 = vsub.f32 %v1401_v22, %v176_v62  ;;  %v267_v8 = vsel %vm48_vm0, %v223_v40, 0.0  ;;  %v275_v23 = vmul.f32 %v1427_v5, %v1427_v5 }
  0xce   :  { %268 = vadd.xlane.f32.xlu0 %v267_v8  ;;  %v274_v22 = vmul.f32 %v1414_v43, %v1414_v43  ;;  %v298_v5 = vsel %vm48_vm0, %v276_v18, 0.0  ;;  %v279_v43 = vmul.f32 %v1461_v27, %v1461_v27  ;;  %v310_v27 = vsel %vm48_vm0, %v280_v12, 0.0 }
  0xcf   :  { %1018 = vmatmul.mubr.msk.f32.gmra.mxu0 %vm48_vm0, %v208_v63  ;;  %1058 = vmatmul.mubr.msk.f32.gmra.mxu1 %vm48_vm0, %v192_v9  ;;  %v224_v16 = vmul.f32 %v192_v9, %v192_v9  ;;  %v295_v45 = vsel %vm48_vm0, %v275_v23, 0.0  ;;  %v331_v35 = vsel %vm48_vm0, %v287_v32, 0.0  ;;  %v288_v56 = vmul.f32 %v208_v63, %v208_v63 }
  0xd0   :  { %v292_v15 = vsel %vm48_vm0, %v274_v22, 0.0  ;;  %v307_v25 = vsel %vm48_vm0, %v279_v43, 0.0 }
  0xd1   :  { %v270_v14 = vsel %vm48_vm0, %v224_v16, 0.0  ;;  %v334_v57 = vsel %vm48_vm0, %v288_v56, 0.0  ;;  %v1599_v56 = vld [vmem:[%s1647_s2] ss:$0 sm:$0xff]  ;;  %s1117_s2 = smov [#allocation2]  }
  0xd2   :  { %290 = vadd.xlane.f32.xlu0 %v289_v7  ;;  %271 = vadd.xlane.f32.xlu1 %v270_v14  ;;  %s864_s27 = sshll.u32 %s1117_s2, 4  ;;  %s865_s27 = int_to_ptr.vmem [resolvable:$true] %s864_s27 }
  0xd3   :  { %s1095_s28 = scalar_lea.vmem %s865_s27, 2048  ;;  %p1100_p1 = scmp.lt.s32.totalorder %s865_s27, %s865_s27 }
  0xd4   :  { %p1096_p0 = scmp.ne.s32.totalorder %s865_s27, %s1095_s28  ;;  %p1101_p2 = scmp.lt.s32.totalorder %s1095_s28, %s1095_s28 }
  0xd6   :  { %296 = vadd.xlane.f32.xlu0 %v295_v45  ;;  %293 = vadd.xlane.f32.xlu1 %v292_v15  ;;  %p1102_p3 = por %p1101_p2, %p1100_p1 }
  0xd8   :  { %p1103_p4 = pnand %p1102_p3, %p1096_p0 }
  0xda   :  { %302 = vadd.xlane.f32.xlu0 %v301_v21  ;;  %299 = vadd.xlane.f32.xlu1 %v298_v5 }
  0xde   :  { %308 = vadd.xlane.f32.xlu0 %v307_v25  ;;  %305 = vadd.xlane.f32.xlu1 %v304_v13 }
  0xe2   :  { %314 = vadd.xlane.f32.xlu0 %v313_v28  ;;  %311 = vadd.xlane.f32.xlu1 %v310_v27 }
  0xe6   :  { %320 = vadd.xlane.f32.xlu0 %v319_v29  ;;  %317 = vadd.xlane.f32.xlu1 %v316_v41 }
  0xea   :  { %326 = vadd.xlane.f32.xlu0 %v325_v31  ;;  %323 = vadd.xlane.f32.xlu1 %v322_v53 }
  0xee   :  { %332 = vadd.xlane.f32.xlu0 %v331_v35  ;;  %329 = vadd.xlane.f32.xlu1 %v328_v19 }
  0xf2   :  { %335 = vadd.xlane.f32.xlu1 %v334_v57 }
 0x123   :  { %v230_v37 = vpop.xlane.xlu1 %229 }
 0x124   :  { %v227_v36 = vpop.xlane.xlu0 %226 }
 0x128   :  { %v233_v38 = vpop.xlane.xlu0 %232 }
 0x12b   :  { %v236_v39 = vpop.xlane.xlu1 %235 }
 0x12f   :  { %v239_v42 = vpop.xlane.xlu0 %238 }
 0x133   :  { %v242_v44 = vpop.xlane.xlu1 %241 }
 0x137   :  { %v245_v61 = vpop.xlane.xlu0 %244 }
 0x13b   :  { %v248_v60 = vpop.xlane.xlu1 %247 }
 0x13f   :  { %v251_v26 = vpop.xlane.xlu0 %250 }
 0x143   :  { %v1578_v46 = vpop.xlane.xlu1 %253 }
 0x147   :  { %v1580_v49 = vpop.xlane.xlu0 %256 }
 0x14b   :  { %v1582_v50 = vpop.xlane.xlu1 %259 }
 0x14f   :  { %v1584_v51 = vpop.xlane.xlu0 %262 }
 0x153   :  { %v1586_v0 = vpop.xlane.xlu1 %265 }
 0x157   :  { %v1588_v4 = vpop.xlane.xlu0 %268 }
 0x158   :  { %v998_v11 = vpop.f32.mrf.mxu0 }
 0x159   :  { %v1038_v59 = vpop.f32.mrf.mxu1 }
 0x15a   :  { %v532_v7 = vpop.f32.mrf.mxu0 }
 0x15b   :  { %v1590_v3 = vpop.xlane.xlu1 %271  ;;  %v291_v2 = vpop.xlane.xlu0 %290 }
 0x15c   :  { %v337_v33 = vadd.f32 %v291_v2, %v227_v36  ;;  %v725_v14 = vpop.f32.mrf.mxu1 }
 0x15d   :  { %v726_v32 = vadd.f32 %v725_v14, %v532_v7 }
 0x15e   :  { %v353_v54 = vmul.f32 0.0078125, %v337_v33 }
 0x15f   :  { %v294_v1 = vpop.xlane.xlu1 %293  ;;  %v297_v58 = vpop.xlane.xlu0 %296 }
 0x160   :  { %v338_v55 = vadd.f32 %v294_v1, %v230_v37  ;;  %v369_v10 = vadd.f32 1e-05, %v353_v54  ;;  %v339_v62 = vadd.f32 %v297_v58, %v233_v38  ;;  %v1001_v15 = vpop.f32.mrf.mxu0  ;;  %v1041_v47 = vpop.f32.mrf.mxu1 }
 0x162   :  { %v354_v40 = vmul.f32 0.0078125, %v338_v55  ;;  %1063 = vrsqrt.f32 %v369_v10  ;;  %v355_v9 = vmul.f32 0.0078125, %v339_v62  ;;  %v542_v6 = vpop.f32.mrf.mxu0  ;;  %v735_v12 = vpop.f32.mrf.mxu1 }
 0x163   :  { %v300_v63 = vpop.xlane.xlu1 %299  ;;  %v303_v16 = vpop.xlane.xlu0 %302  ;;  %v736_v54 = vadd.f32 %v735_v12, %v542_v6 }
 0x164   :  { %v370_v8 = vadd.f32 1e-05, %v354_v40  ;;  %v340_v17 = vadd.f32 %v300_v63, %v236_v39  ;;  %v371_v23 = vadd.f32 1e-05, %v355_v9  ;;  %v341_v22 = vadd.f32 %v303_v16, %v239_v42 }
 0x166   :  { %1065 = vrsqrt.f32 %v370_v8  ;;  %v356_v45 = vmul.f32 0.0078125, %v340_v17  ;;  %v357_v18 = vmul.f32 0.0078125, %v341_v22  ;;  %v741_v8 = vadd.f32 %v1041_v47, %v1001_v15 }
 0x167   :  { %1067 = vrsqrt.f32 %v371_v23  ;;  %v306_v5 = vpop.xlane.xlu1 %305  ;;  %v309_v43 = vpop.xlane.xlu0 %308 }
 0x168   :  { %v372_v21 = vadd.f32 1e-05, %v356_v45  ;;  %v373_v24 = vadd.f32 1e-05, %v357_v18  ;;  %v342_v25 = vadd.f32 %v306_v5, %v242_v44  ;;  %v343_v13 = vadd.f32 %v309_v43, %v245_v61  ;;  %v1592_v29 = vpop.f32.mrf.mxu0  ;;  %v1594_v41 = vpop.f32.mrf.mxu1 }
 0x16a   :  { %1069 = vrsqrt.f32 %v372_v21  ;;  %v358_v28 = vmul.f32 0.0078125, %v342_v25  ;;  %v359_v27 = vmul.f32 0.0078125, %v343_v13  ;;  %v552_v38 = vpop.f32.mrf.mxu0  ;;  %v745_v39 = vpop.f32.mrf.mxu1 }
 0x16b   :  { %1071 = vrsqrt.f32 %v373_v24  ;;  %v312_v20 = vpop.xlane.xlu1 %311  ;;  %v315_v52 = vpop.xlane.xlu0 %314  ;;  %v746_v16 = vadd.f32 %v745_v39, %v552_v38 }
 0x16c   :  { %v374_v34 = vadd.f32 1e-05, %v358_v28  ;;  %v375_v30 = vadd.f32 1e-05, %v359_v27  ;;  %v344_v31 = vadd.f32 %v312_v20, %v248_v60  ;;  %v345_v53 = vadd.f32 %v315_v52, %v251_v26 }
 0x16d   :  { %v731_v60 = vadd.f32 %v1038_v59, %v998_v11  ;;  %v751_v27 = vadd.f32 %v1594_v41, %v1592_v29 }
 0x16e   :  { %1073 = vrsqrt.f32 %v374_v34  ;;  %v360_v48 = vmul.f32 0.0078125, %v344_v31  ;;  %v361_v35 = vmul.f32 0.0078125, %v345_v53 }
 0x16f   :  { %v1064_v19 = vpop.eup %1063  ;;  %1075 = vrsqrt.f32 %v375_v30  ;;  %v318_v57 = vpop.xlane.xlu1 %317 }
 0x170   :  { %v321_v36 = vpop.xlane.xlu0 %320  ;;  %v804_v37 = vmul.f32 %v1064_v19, %v726_v32  ;;  %v376_v42 = vadd.f32 1e-05, %v360_v48  ;;  %v377_v44 = vadd.f32 1e-05, %v361_v35  ;;  %v346_v61 = vadd.f32 %v318_v57, %v1578_v46  ;;  %v1007_v1 = vpop.f32.mrf.mxu0 }
 0x171   :  { %v347_v26 = vadd.f32 %v321_v36, %v1580_v49  ;;  %v1047_v55 = vpop.f32.mrf.mxu1 }
 0x172   :  { %v827_v33 = vadd.f32 %v1599_v56, %v804_v37  ;;  %1077 = vrsqrt.f32 %v376_v42  ;;  %v362_v58 = vmul.f32 0.0078125, %v346_v61  ;;  %v562_v22 = vpop.f32.mrf.mxu0  ;;  %v761_v57 = vadd.f32 %v1047_v55, %v1007_v1 }
 0x173   :  { %v1066_v2 = vpop.eup %1065  ;;  %1079 = vrsqrt.f32 %v377_v44  ;;  %v363_v40 = vmul.f32 0.0078125, %v347_v26  ;;  %v324_v9 = vpop.xlane.xlu1 %323 }
 0x174   :  { %v1068_v10 = vpop.eup %1067  ;;  %v805_v62 = vmul.f32 %v1066_v2, %v731_v60  ;;  %v327_v63 = vpop.xlane.xlu0 %326  ;;  %843 = vst.msk [vmem:[#allocation2] sm:$0xff] %vm48_vm0, %v827_v33  ;;  %v378_v11 = vadd.f32 1e-05, %v362_v58  ;;  %v348_v49 = vadd.f32 %v324_v9, %v1582_v50 }
 0x175   :  { %v806_v46 = vmul.f32 %v1068_v10, %v736_v54  ;;  %v349_v59 = vadd.f32 %v327_v63, %v1584_v51  ;;  %v379_v7 = vadd.f32 1e-05, %v363_v40  ;;  %v755_v45 = vpop.f32.mrf.mxu1 }
 0x176   :  { %v828_v17 = vadd.f32 %v1599_v56, %v805_v62  ;;  %1081 = vrsqrt.f32 %v378_v11  ;;  %v364_v18 = vmul.f32 0.0078125, %v348_v49  ;;  %v756_v30 = vadd.f32 %v755_v45, %v562_v22 }
 0x177   :  { %v1070_v14 = vpop.eup %1069  ;;  %v829_v23 = vadd.f32 %v1599_v56, %v806_v46  ;;  %v365_v21 = vmul.f32 0.0078125, %v349_v59  ;;  %1083 = vrsqrt.f32 %v379_v7  ;;  %v330_v50 = vpop.xlane.xlu1 %329 }
 0x178   :  { %v1072_v5 = vpop.eup %1071  ;;  %844 = vst.msk [vmem:[#allocation2 + $0x8] sm:$0xff] %vm48_vm0, %v828_v17  ;;  %v807_v43 = vmul.f32 %v1070_v14, %v741_v8  ;;  %v333_v51 = vpop.xlane.xlu0 %332  ;;  %v380_v47 = vadd.f32 1e-05, %v364_v18  ;;  %v350_v13 = vadd.f32 %v330_v50, %v1586_v0 }
 0x179   :  { %845 = vst.msk [vmem:[#allocation2 + $0x10] sm:$0xff] %vm48_vm0, %v829_v23  ;;  %v808_v15 = vmul.f32 %v1072_v5, %v746_v16  ;;  %v1010_v24 = vpop.f32.mrf.mxu0  ;;  %v1050_v25 = vpop.f32.mrf.mxu1  ;;  %v381_v12 = vadd.f32 1e-05, %v365_v21  ;;  %v351_v28 = vadd.f32 %v333_v51, %v1588_v4 }
 0x17a   :  { %v830_v6 = vadd.f32 %v1599_v56, %v807_v43  ;;  %1085 = vrsqrt.f32 %v380_v47  ;;  %v366_v52 = vmul.f32 0.0078125, %v350_v13  ;;  %v771_v58 = vadd.f32 %v1050_v25, %v1010_v24 }
 0x17b   :  { %v831_v20 = vadd.f32 %v1599_v56, %v808_v15  ;;  %v1074_v34 = vpop.eup %1073  ;;  %v336_v31 = vpop.xlane.xlu1 %335  ;;  %1087 = vrsqrt.f32 %v381_v12  ;;  %v367_v29 = vmul.f32 0.0078125, %v351_v28 }
 0x17c   :  { %846 = vst.msk [vmem:[#allocation2 + $0x18] sm:$0xff] %vm48_vm0, %v830_v6  ;;  %v1076_v53 = vpop.eup %1075  ;;  %v809_v32 = vmul.f32 %v1074_v34, %v751_v27  ;;  %v382_v0 = vadd.f32 1e-05, %v366_v52  ;;  %v572_v48 = vpop.f32.mrf.mxu0  ;;  %v352_v4 = vadd.f32 %v336_v31, %v1590_v3 }
 0x17d   :  { %847 = vst.msk [vmem:[#allocation2 + $0x20] sm:$0xff] %vm48_vm0, %v831_v20  ;;  %v765_v35 = vpop.f32.mrf.mxu1  ;;  %v810_v19 = vmul.f32 %v1076_v53, %v756_v30  ;;  %v383_v33 = vadd.f32 1e-05, %v367_v29 }
 0x17e   :  { %v832_v41 = vadd.f32 %v1599_v56, %v809_v32  ;;  %1089 = vrsqrt.f32 %v382_v0  ;;  %v368_v36 = vmul.f32 0.0078125, %v352_v4  ;;  %v766_v44 = vadd.f32 %v765_v35, %v572_v48 }
 0x17f   :  { %v1013_v37 = vpop.f32.mrf.mxu0  ;;  %v1053_v38 = vpop.f32.mrf.mxu1  ;;  %v833_v42 = vadd.f32 %v1599_v56, %v810_v19 }
 0x180   :  { %v1078_v39 = vpop.eup %1077  ;;  %848 = vst.msk [vmem:[#allocation2 + $0x28] sm:$0xff] %vm48_vm0, %v832_v41  ;;  %v384_v26 = vadd.f32 1e-05, %v368_v36  ;;  %v781_v11 = vadd.f32 %v1053_v38, %v1013_v37 }
 0x181   :  { %v1080_v61 = vpop.eup %1079  ;;  %v811_v60 = vmul.f32 %v1078_v39, %v761_v57  ;;  %v582_v3 = vpop.f32.mrf.mxu0  ;;  %849 = vst.msk [vmem:[#allocation2 + $0x30] sm:$0xff] %vm48_vm0, %v833_v42 }
 0x182   :  { %v775_v2 = vpop.f32.mrf.mxu1  ;;  %v812_v54 = vmul.f32 %v1080_v61, %v766_v44  ;;  %1091 = vrsqrt.f32 %v384_v26 }
 0x183   :  { %v776_v1 = vadd.f32 %v775_v2, %v582_v3  ;;  %v834_v55 = vadd.f32 %v1599_v56, %v811_v60  ;;  %v1082_v10 = vpop.eup %1081  ;;  %1093 = vrsqrt.f32 %v383_v33 }
 0x184   :  { %v835_v62 = vadd.f32 %v1599_v56, %v812_v54  ;;  %v1084_v40 = vpop.eup %1083  ;;  %v813_v9 = vmul.f32 %v1082_v10, %v771_v58 }
 0x185   :  { %850 = vst.msk [vmem:[#allocation2 + $0x38] sm:$0xff] %vm48_vm0, %v834_v55  ;;  %v814_v63 = vmul.f32 %v1084_v40, %v776_v1 }
 0x186   :  { %851 = vst.msk [vmem:[#allocation2 + $0x40] sm:$0xff] %vm48_vm0, %v835_v62  ;;  %v836_v46 = vadd.f32 %v1599_v56, %v813_v9 }
 0x187   :  { %v1016_v49 = vpop.f32.mrf.mxu0  ;;  %v1056_v59 = vpop.f32.mrf.mxu1  ;;  %v837_v17 = vadd.f32 %v1599_v56, %v814_v63 }
 0x188   :  { %v1086_v8 = vpop.eup %1085  ;;  %852 = vst.msk [vmem:[#allocation2 + $0x48] sm:$0xff] %vm48_vm0, %v836_v46  ;;  %v791_v18 = vadd.f32 %v1056_v59, %v1016_v49 }
 0x189   :  { %v815_v16 = vmul.f32 %v1086_v8, %v781_v11  ;;  %v592_v7 = vpop.f32.mrf.mxu0  ;;  %v785_v14 = vpop.f32.mrf.mxu1  ;;  %853 = vst.msk [vmem:[#allocation2 + $0x50] sm:$0xff] %vm48_vm0, %v837_v17 }
 0x18a   :  { %v786_v23 = vadd.f32 %v785_v14, %v592_v7  ;;  %v1088_v22 = vpop.eup %1087 }
 0x18b   :  { %v838_v45 = vadd.f32 %v1599_v56, %v815_v16  ;;  %v1090_v21 = vpop.eup %1089 }
 0x18c   :  { %v816_v5 = vmul.f32 %v1088_v22, %v786_v23  ;;  %v817_v43 = vmul.f32 %v1090_v21, %v791_v18 }
 0x18d   :  { %854 = vst.msk [vmem:[#allocation2 + $0x58] sm:$0xff] %vm48_vm0, %v838_v45 }
 0x18e   :  { %v839_v50 = vadd.f32 %v1599_v56, %v816_v5  ;;  %v840_v51 = vadd.f32 %v1599_v56, %v817_v43 }
 0x18f   :  { %v1019_v15 = vpop.f32.mrf.mxu0  ;;  %v1059_v47 = vpop.f32.mrf.mxu1 }
 0x190   :  { %855 = vst.msk [vmem:[#allocation2 + $0x60] sm:$0xff] %vm48_vm0, %v839_v50  ;;  %v801_v24 = vadd.f32 %v1059_v47, %v1019_v15  ;;  %v1092_v25 = vpop.eup %1091  ;;  %856 = vst.msk [vmem:[#allocation2 + $0x68] sm:$0xff] %vm48_vm0, %v840_v51 }
 0x191   :  { %v602_v13 = vpop.f32.mrf.mxu0  ;;  %v795_v6 = vpop.f32.mrf.mxu1 }
 0x192   :  { %v819_v12 = vmul.f32 %v1092_v25, %v801_v24  ;;  %v796_v28 = vadd.f32 %v795_v6, %v602_v13  ;;  %v1094_v27 = vpop.eup %1093 }
 0x194   :  { %v842_v20 = vadd.f32 %v1599_v56, %v819_v12  ;;  %v818_v52 = vmul.f32 %v1094_v27, %v796_v28 }
 0x196   :  { %858 = vst.msk [vmem:[#allocation2 + $0x78] sm:$0xff] %vm48_vm0, %v842_v20  ;;  %v841_v34 = vadd.f32 %v1599_v56, %v818_v52 }
 0x198   :  { %857 = vst.msk [vmem:[#allocation2 + $0x70] sm:$0xff] %vm48_vm0, %v841_v34 }
 0x199   :  { %1106 = shalt.err (!%p1103_p4)
}
 0x19a   :  { %s1118_s29 = smov 128   ;;  %s1119_s1 = smov 8  }
 0x19b   :  { %870 = dma.vmem_to_hbm [thread:$0]  %s865_s27, 2048, %s1648_s3, [#allocation3], %s1118_s29, %s1118_s29, %s1119_s1  }
 0x19c   :  { %1115 = dma.done.wait [#allocation3], 2048  }
 0x19d   :  { %1116 = vsyncadd [#allocation3], 4294965248 }
 0x19e   :  { %874 = vsyncpa [#allocation3], 1 }

</bundles_post_ra>
